<compile_context>
chip_gen: v7x
topology: tpu7x:2x2x1
jax: 0.10.0
libtpu: 0.0.40
codegen_flags: <defaults>
</compile_context>

<pallas_src>
import jax
import jax.numpy as jnp
from jax.experimental import pallas as pl
from jax.experimental.pallas import tpu as pltpu

NUM_CLASSES = 20          # len(self.weight) in the module (weight unused by forward())
_LANES = 128

# Tile caps (rows per grid step).  The natural [N, C] path stores its logits
# block lane-padded in VMEM (20 -> 128 lanes), so it uses a smaller cap.
_TILE_NC = 16 * 1024      # primary: logits fed as [N, C], transposed in-kernel
_TILE_CN = 32 * 1024      # fallback: logits pre-transposed to [C, N] in the wrapper
_VMEM_LIMIT_BYTES = 48 * 1024 * 1024

_in_kernel_transpose_ok = None   # feature-detect cache: None=unknown, True/False


def _round_up(x, m):
    return ((x + m - 1) // m) * m


def _focal_partials(p_cn, t_1n, row_ok):
    """Core math on a lane-dense (C, TN) f32 logits tile.

    p_cn:   (C, TN) f32 logits (classes on sublanes, rows on lanes)
    t_1n:   (1, TN) int32 labels (negative = ignore)
    row_ok: (1, TN) bool, row index < N (ragged-tile mask)
    Returns (partial_sum, partial_count), each (1, 1) f32.
    """
    valid = jnp.logical_and(row_ok, t_1n >= 0)                       # (1, TN)
    t_safe = jnp.where(valid, t_1n, 0)

    # Numerically-stable log-softmax (the reference's exp/div/log, reorganized;
    # log_pt falls out for free — no divide, no second transcendental).
    m = jnp.max(p_cn, axis=0, keepdims=True)                         # (1, TN)
    log_denom = m + jnp.log(jnp.sum(jnp.exp(p_cn - m), axis=0, keepdims=True))

    # Gather the target-class logit with a one-hot mask over the class axis.
    cls = jax.lax.broadcasted_iota(jnp.int32, p_cn.shape, 0)         # (C, TN)
    p_t = jnp.sum(jnp.where(cls == t_safe, p_cn, 0.0), axis=0, keepdims=True)

    log_pt = p_t - log_denom                                         # (1, TN)
    pt = jnp.exp(log_pt)
    term = jnp.where(valid, -((1.0 - pt) ** 2) * log_pt, 0.0)        # masked rows -> 0

    part_sum = jnp.sum(term, axis=1, keepdims=True)                  # (1, 1)
    part_cnt = jnp.sum(valid.astype(jnp.float32), axis=1, keepdims=True)
    return part_sum, part_cnt


def _make_kernels(n_rows, tile):
    """Two kernel variants sharing the same math; closures carry static N / tile."""

    def _row_ok():
        row0 = pl.program_id(0) * tile
        lane = jax.lax.broadcasted_iota(jnp.int32, (1, tile), 1)
        return (row0 + lane) < n_rows

    def _write(sum_ref, cnt_ref, s, c):
        sum_ref[...] = jnp.broadcast_to(s, sum_ref.shape)
        cnt_ref[...] = jnp.broadcast_to(c, cnt_ref.shape)

    def kernel_nc(p_ref, t_ref, sum_ref, cnt_ref):
        # p_ref: (TN, C) natural layout; lane-densify with an in-kernel XLU transpose.
        p_cn = jnp.transpose(p_ref[...].astype(jnp.float32), (1, 0))
        s, c = _focal_partials(p_cn, t_ref[...], _row_ok())
        _write(sum_ref, cnt_ref, s, c)

    def kernel_cn(p_ref, t_ref, sum_ref, cnt_ref):
        # p_ref: (C, TN) already lane-dense (fallback path, wrapper transposed).
        s, c = _focal_partials(p_ref[...].astype(jnp.float32), t_ref[...], _row_ok())
        _write(sum_ref, cnt_ref, s, c)

    return kernel_nc, kernel_cn


def _partial_sums(kernel, p_arr, p_block, p_index, t2d, tile, grid):
    """Run the kernel over the row grid; returns per-tile (sum, count) partials."""
    part = jax.ShapeDtypeStruct((1, grid * _LANES), jnp.float32)
    part_spec = pl.BlockSpec((1, _LANES), lambda i: (0, i))
    return pl.pallas_call(
        kernel,
        out_shape=(part, part),
        grid_spec=pltpu.PrefetchScalarGridSpec(
            num_scalar_prefetch=0,
            grid=(grid,),
            in_specs=[
                pl.BlockSpec(p_block, p_index),              # logits tile
                pl.BlockSpec((1, tile), lambda i: (0, i)),   # labels tile
            ],
            out_specs=(part_spec, part_spec),                # tiny per-tile partials
        ),
        compiler_params=pltpu.CompilerParams(
            dimension_semantics=("parallel",),               # disjoint outputs -> megacore
            vmem_limit_bytes=_VMEM_LIMIT_BYTES,
        ),
    )(p_arr, t2d)


def focal_loss(p, target, *, tile_n=None):
    """p: [N, C] float logits; target: [N] int labels (negative = ignore)."""
    global _in_kernel_transpose_ok
    N, C = p.shape
    t2d = target.astype(jnp.int32).reshape(1, N)

    def pick_tiles(cap):
        # Multiple of 128 (rows sit on the lane axis); floor-based so only the
        # last block is ragged; that block is masked in-kernel.
        t = min(cap, max(_LANES, (N // _LANES) * _LANES))
        return t, pl.cdiv(N, t)

    sums = cnts = None
    # --- primary: logits in their natural [N, C] layout, transpose in-kernel ---
    if _in_kernel_transpose_ok is not False:
        tile, grid = pick_tiles(tile_n if tile_n is not None else _TILE_NC)
        kernel_nc, _ = _make_kernels(N, tile)
        try:
            sums, cnts = _partial_sums(kernel_nc, p, (tile, C), lambda i: (i, 0),
                                       t2d, tile, grid)
            _in_kernel_transpose_ok = True
        except Exception:
            # Mosaic on this jax version can't lower the (TN, C) -> (C, TN)
            # transpose (or the lane-padded block overflowed scoped VMEM).
            _in_kernel_transpose_ok = False

    # --- fallback: one extra HBM pass to pre-transpose the logits ---
    if _in_kernel_transpose_ok is False:
        tile, grid = pick_tiles(tile_n if tile_n is not None else _TILE_CN)
        _, kernel_cn = _make_kernels(N, tile)
        p_cn = jnp.transpose(p, (1, 0))                      # (C, N)
        sums, cnts = _partial_sums(kernel_cn, p_cn, (C, tile), lambda i: (0, i),
                                   t2d, tile, grid)

    total = jnp.sum(sums.reshape(grid, _LANES)[:, 0])        # one partial per tile
    count = jnp.sum(cnts.reshape(grid, _LANES)[:, 0])
    # NOTE: if every label is negative this is NaN — same as the PyTorch reference.
    return total / count


def focal_loss_ref(p, target):
    """Pure-JAX reference mirroring the PyTorch forward (exp / div / log form)."""
    valid = target >= 0
    t_safe = jnp.where(valid, target, 0)
    prob = jnp.exp(p)
    pt = jnp.take_along_axis(prob, t_safe[:, None], axis=1)[:, 0] / jnp.sum(prob, axis=1)
    term = -((1.0 - pt) ** 2) * jnp.log(pt)
    vm = valid.astype(jnp.float32)
    return jnp.sum(term * vm) / jnp.sum(vm)


if __name__ == "__main__":
    key = jax.random.PRNGKey(0)
    k1, k2, k3 = jax.random.split(key, 3)

    # ScanNet-style inputs: per-point logits over 20 classes; negative = ignore.
    N, C = 300, NUM_CLASSES            # N not a multiple of 128 -> exercises ragged mask
    p = jax.random.normal(k1, (N, C), dtype=jnp.float32)
    target = jax.random.randint(k2, (N,), 0, C, dtype=jnp.int32)
    target = jnp.where(jax.random.bernoulli(k3, 0.2, (N,)), -100, target)

    ref = focal_loss_ref(p, target)

    loss = focal_loss(p, target)                  # default tiles (ragged last block)
    jax.block_until_ready(loss)
    assert jnp.allclose(loss, ref, atol=1e-5, rtol=1e-5), (loss, ref)

    loss_mt = focal_loss(p, target, tile_n=128)   # small tiles: multi-step grid + partials
    jax.block_until_ready(loss_mt)
    assert jnp.allclose(loss_mt, ref, atol=1e-5, rtol=1e-5), (loss_mt, ref)

    print("KERNEL_OK")
</pallas_src>

<mosaic_0001>
module attributes {stable_mosaic.version = 11 : i64} {
  func.func @kernel_nc(%arg0: i32, %arg1: memref<256x20xf32, #tpu.memory_space<vmem>>, %arg2: memref<1x256xi32, #tpu.memory_space<vmem>>, %arg3: memref<1x128xf32, #tpu.memory_space<vmem>>, %arg4: memref<1x128xf32, #tpu.memory_space<vmem>>) attributes {dimension_semantics = [#tpu.dimension_semantics<parallel>], iteration_bounds = array<i64: 2>, scalar_prefetch = 0 : i64, scratch_operands = 0 : i64, tpu.core_type = #tpu.core_type<tc>, window_params = [{transform_indices = @transform_0, window_bounds = array<i64: 256, 20>}, {transform_indices = @transform_1, window_bounds = array<i64: 1, 256>}, {transform_indices = @transform_2, window_bounds = array<i64: 1, 128>}, {transform_indices = @transform_3, window_bounds = array<i64: 1, 128>}]} {
    %c0 = arith.constant 0 : index
    %c0_0 = arith.constant 0 : index
    %0 = vector.load %arg1[%c0, %c0_0] : memref<256x20xf32, #tpu.memory_space<vmem>>, vector<256x20xf32>
    %1 = tpu.transpose %0, [1, 0] : vector<256x20xf32> -> vector<20x256xf32>
    %c0_1 = arith.constant 0 : index
    %c0_2 = arith.constant 0 : index
    %2 = vector.load %arg2[%c0_1, %c0_2] : memref<1x256xi32, #tpu.memory_space<vmem>>, vector<1x256xi32>
    %c256_i32 = arith.constant 256 : i32
    %3 = arith.muli %arg0, %c256_i32 : i32
    %4 = tpu.iota {dimensions = array<i32: 1>} : vector<1x256xi32>
    %5 = vector.broadcast %3 : i32 to vector<1x256xi32>
    %6 = arith.addi %5, %4 : vector<1x256xi32>
    %c300_i32 = arith.constant 300 : i32
    %7 = vector.broadcast %c300_i32 : i32 to vector<1x256xi32>
    %8 = arith.cmpi slt, %6, %7 : vector<1x256xi32>
    %c0_i32 = arith.constant 0 : i32
    %9 = vector.broadcast %c0_i32 : i32 to vector<1x256xi32>
    %10 = arith.cmpi sge, %2, %9 : vector<1x256xi32>
    %11 = arith.andi %8, %10 : vector<1x256xi1>
    %c0_i32_3 = arith.constant 0 : i32
    %12 = vector.broadcast %c0_i32_3 : i32 to vector<1x256xi32>
    %13 = arith.select %11, %2, %12 : vector<1x256xi1>, vector<1x256xi32>
    %cst = arith.constant dense<0xFF800000> : vector<256xf32>
    %14 = vector.multi_reduction <maximumf>, %1, %cst [0] : vector<20x256xf32> to vector<256xf32>
    %15 = vector.shape_cast %14 : vector<256xf32> to vector<1x256xf32>
    %16 = vector.broadcast %15 : vector<1x256xf32> to vector<20x256xf32>
    %17 = arith.subf %1, %16 : vector<20x256xf32>
    %18 = math.exp %17 : vector<20x256xf32>
    %cst_4 = arith.constant dense<0.000000e+00> : vector<256xf32>
    %19 = vector.multi_reduction <add>, %18, %cst_4 [0] : vector<20x256xf32> to vector<256xf32>
    %20 = vector.shape_cast %19 : vector<256xf32> to vector<1x256xf32>
    %21 = math.log %20 : vector<1x256xf32>
    %22 = arith.addf %15, %21 : vector<1x256xf32>
    %23 = tpu.iota {dimensions = array<i32: 0>} : vector<20x256xi32>
    %24 = vector.broadcast %13 : vector<1x256xi32> to vector<20x256xi32>
    %25 = arith.cmpi eq, %23, %24 : vector<20x256xi32>
    %cst_5 = arith.constant 0.000000e+00 : f32
    %26 = vector.broadcast %cst_5 : f32 to vector<20x256xf32>
    %27 = arith.select %25, %1, %26 : vector<20x256xi1>, vector<20x256xf32>
    %cst_6 = arith.constant dense<0.000000e+00> : vector<256xf32>
    %28 = vector.multi_reduction <add>, %27, %cst_6 [0] : vector<20x256xf32> to vector<256xf32>
    %29 = vector.shape_cast %28 : vector<256xf32> to vector<1x256xf32>
    %30 = arith.subf %29, %22 : vector<1x256xf32>
    %31 = math.exp %30 : vector<1x256xf32>
    %cst_7 = arith.constant 1.000000e+00 : f32
    %32 = vector.broadcast %cst_7 : f32 to vector<1x256xf32>
    %33 = arith.subf %32, %31 : vector<1x256xf32>
    %34 = arith.mulf %33, %33 : vector<1x256xf32>
    %cst_8 = arith.constant 0.000000e+00 : f32
    %35 = vector.broadcast %cst_8 : f32 to vector<1x256xf32>
    %36 = arith.subf %35, %34 : vector<1x256xf32>
    %37 = arith.mulf %36, %30 : vector<1x256xf32>
    %cst_9 = arith.constant 0.000000e+00 : f32
    %38 = vector.broadcast %cst_9 : f32 to vector<1x256xf32>
    %39 = arith.select %11, %37, %38 : vector<1x256xi1>, vector<1x256xf32>
    %cst_10 = arith.constant dense<0.000000e+00> : vector<1xf32>
    %40 = vector.multi_reduction <add>, %39, %cst_10 [1] : vector<1x256xf32> to vector<1xf32>
    %41 = vector.shape_cast %40 : vector<1xf32> to vector<1x1xf32>
    %42 = arith.extui %11 : vector<1x256xi1> to vector<1x256xi32>
    %43 = arith.sitofp %42 : vector<1x256xi32> to vector<1x256xf32>
    %cst_11 = arith.constant dense<0.000000e+00> : vector<1xf32>
    %44 = vector.multi_reduction <add>, %43, %cst_11 [1] : vector<1x256xf32> to vector<1xf32>
    %45 = vector.shape_cast %44 : vector<1xf32> to vector<1x1xf32>
    %46 = vector.shape_cast %41 : vector<1x1xf32> to vector<1x1xf32>
    %47 = vector.broadcast %46 : vector<1x1xf32> to vector<1x128xf32>
    %c0_12 = arith.constant 0 : index
    %c0_13 = arith.constant 0 : index
    %48 = vector.load %arg3[%c0_12, %c0_13] : memref<1x128xf32, #tpu.memory_space<vmem>>, vector<1x128xf32>
    tpu.vector_store %arg3[%c0_12, %c0_13], %47 {strides = array<i32>} : memref<1x128xf32, #tpu.memory_space<vmem>>, vector<1x128xf32>,
    %49 = vector.shape_cast %45 : vector<1x1xf32> to vector<1x1xf32>
    %50 = vector.broadcast %49 : vector<1x1xf32> to vector<1x128xf32>
    %c0_14 = arith.constant 0 : index
    %c0_15 = arith.constant 0 : index
    %51 = vector.load %arg4[%c0_14, %c0_15] : memref<1x128xf32, #tpu.memory_space<vmem>>, vector<1x128xf32>
    tpu.vector_store %arg4[%c0_14, %c0_15], %50 {strides = array<i32>} : memref<1x128xf32, #tpu.memory_space<vmem>>, vector<1x128xf32>,
    return
  }
  func.func @transform_0(%arg0: i32) -> (i32, i32) {
    %c0_i32 = arith.constant 0 : i32
    %c0_i32_0 = arith.constant 0 : i32
    return %arg0, %c0_i32 : i32, i32
  }
  func.func @transform_1(%arg0: i32) -> (i32, i32) {
    %c0_i32 = arith.constant 0 : i32
    %c0_i32_0 = arith.constant 0 : i32
    return %c0_i32, %arg0 : i32, i32
  }
  func.func @transform_2(%arg0: i32) -> (i32, i32) {
    %c0_i32 = arith.constant 0 : i32
    %c0_i32_0 = arith.constant 0 : i32
    return %c0_i32, %arg0 : i32, i32
  }
  func.func @transform_3(%arg0: i32) -> (i32, i32) {
    %c0_i32 = arith.constant 0 : i32
    %c0_i32_0 = arith.constant 0 : i32
    return %c0_i32, %arg0 : i32, i32
  }
}

module attributes {stable_mosaic.version = 11 : i64} {
  func.func @kernel_cn(%arg0: i32, %arg1: memref<20x256xf32, #tpu.memory_space<vmem>>, %arg2: memref<1x256xi32, #tpu.memory_space<vmem>>, %arg3: memref<1x128xf32, #tpu.memory_space<vmem>>, %arg4: memref<1x128xf32, #tpu.memory_space<vmem>>) attributes {dimension_semantics = [#tpu.dimension_semantics<parallel>], iteration_bounds = array<i64: 2>, scalar_prefetch = 0 : i64, scratch_operands = 0 : i64, tpu.core_type = #tpu.core_type<tc>, window_params = [{transform_indices = @transform_0, window_bounds = array<i64: 20, 256>}, {transform_indices = @transform_1, window_bounds = array<i64: 1, 256>}, {transform_indices = @transform_2, window_bounds = array<i64: 1, 128>}, {transform_indices = @transform_3, window_bounds = array<i64: 1, 128>}]} {
    %c0 = arith.constant 0 : index
    %c0_0 = arith.constant 0 : index
    %0 = vector.load %arg1[%c0, %c0_0] : memref<20x256xf32, #tpu.memory_space<vmem>>, vector<20x256xf32>
    %c0_1 = arith.constant 0 : index
    %c0_2 = arith.constant 0 : index
    %1 = vector.load %arg2[%c0_1, %c0_2] : memref<1x256xi32, #tpu.memory_space<vmem>>, vector<1x256xi32>
    %c256_i32 = arith.constant 256 : i32
    %2 = arith.muli %arg0, %c256_i32 : i32
    %3 = tpu.iota {dimensions = array<i32: 1>} : vector<1x256xi32>
    %4 = vector.broadcast %2 : i32 to vector<1x256xi32>
    %5 = arith.addi %4, %3 : vector<1x256xi32>
    %c300_i32 = arith.constant 300 : i32
    %6 = vector.broadcast %c300_i32 : i32 to vector<1x256xi32>
    %7 = arith.cmpi slt, %5, %6 : vector<1x256xi32>
    %c0_i32 = arith.constant 0 : i32
    %8 = vector.broadcast %c0_i32 : i32 to vector<1x256xi32>
    %9 = arith.cmpi sge, %1, %8 : vector<1x256xi32>
    %10 = arith.andi %7, %9 : vector<1x256xi1>
    %c0_i32_3 = arith.constant 0 : i32
    %11 = vector.broadcast %c0_i32_3 : i32 to vector<1x256xi32>
    %12 = arith.select %10, %1, %11 : vector<1x256xi1>, vector<1x256xi32>
    %cst = arith.constant dense<0xFF800000> : vector<256xf32>
    %13 = vector.multi_reduction <maximumf>, %0, %cst [0] : vector<20x256xf32> to vector<256xf32>
    %14 = vector.shape_cast %13 : vector<256xf32> to vector<1x256xf32>
    %15 = vector.broadcast %14 : vector<1x256xf32> to vector<20x256xf32>
    %16 = arith.subf %0, %15 : vector<20x256xf32>
    %17 = math.exp %16 : vector<20x256xf32>
    %cst_4 = arith.constant dense<0.000000e+00> : vector<256xf32>
    %18 = vector.multi_reduction <add>, %17, %cst_4 [0] : vector<20x256xf32> to vector<256xf32>
    %19 = vector.shape_cast %18 : vector<256xf32> to vector<1x256xf32>
    %20 = math.log %19 : vector<1x256xf32>
    %21 = arith.addf %14, %20 : vector<1x256xf32>
    %22 = tpu.iota {dimensions = array<i32: 0>} : vector<20x256xi32>
    %23 = vector.broadcast %12 : vector<1x256xi32> to vector<20x256xi32>
    %24 = arith.cmpi eq, %22, %23 : vector<20x256xi32>
    %cst_5 = arith.constant 0.000000e+00 : f32
    %25 = vector.broadcast %cst_5 : f32 to vector<20x256xf32>
    %26 = arith.select %24, %0, %25 : vector<20x256xi1>, vector<20x256xf32>
    %cst_6 = arith.constant dense<0.000000e+00> : vector<256xf32>
    %27 = vector.multi_reduction <add>, %26, %cst_6 [0] : vector<20x256xf32> to vector<256xf32>
    %28 = vector.shape_cast %27 : vector<256xf32> to vector<1x256xf32>
    %29 = arith.subf %28, %21 : vector<1x256xf32>
    %30 = math.exp %29 : vector<1x256xf32>
    %cst_7 = arith.constant 1.000000e+00 : f32
    %31 = vector.broadcast %cst_7 : f32 to vector<1x256xf32>
    %32 = arith.subf %31, %30 : vector<1x256xf32>
    %33 = arith.mulf %32, %32 : vector<1x256xf32>
    %cst_8 = arith.constant 0.000000e+00 : f32
    %34 = vector.broadcast %cst_8 : f32 to vector<1x256xf32>
    %35 = arith.subf %34, %33 : vector<1x256xf32>
    %36 = arith.mulf %35, %29 : vector<1x256xf32>
    %cst_9 = arith.constant 0.000000e+00 : f32
    %37 = vector.broadcast %cst_9 : f32 to vector<1x256xf32>
    %38 = arith.select %10, %36, %37 : vector<1x256xi1>, vector<1x256xf32>
    %cst_10 = arith.constant dense<0.000000e+00> : vector<1xf32>
    %39 = vector.multi_reduction <add>, %38, %cst_10 [1] : vector<1x256xf32> to vector<1xf32>
    %40 = vector.shape_cast %39 : vector<1xf32> to vector<1x1xf32>
    %41 = arith.extui %10 : vector<1x256xi1> to vector<1x256xi32>
    %42 = arith.sitofp %41 : vector<1x256xi32> to vector<1x256xf32>
    %cst_11 = arith.constant dense<0.000000e+00> : vector<1xf32>
    %43 = vector.multi_reduction <add>, %42, %cst_11 [1] : vector<1x256xf32> to vector<1xf32>
    %44 = vector.shape_cast %43 : vector<1xf32> to vector<1x1xf32>
    %45 = vector.shape_cast %40 : vector<1x1xf32> to vector<1x1xf32>
    %46 = vector.broadcast %45 : vector<1x1xf32> to vector<1x128xf32>
    %c0_12 = arith.constant 0 : index
    %c0_13 = arith.constant 0 : index
    %47 = vector.load %arg3[%c0_12, %c0_13] : memref<1x128xf32, #tpu.memory_space<vmem>>, vector<1x128xf32>
    tpu.vector_store %arg3[%c0_12, %c0_13], %46 {strides = array<i32>} : memref<1x128xf32, #tpu.memory_space<vmem>>, vector<1x128xf32>,
    %48 = vector.shape_cast %44 : vector<1x1xf32> to vector<1x1xf32>
    %49 = vector.broadcast %48 : vector<1x1xf32> to vector<1x128xf32>
    %c0_14 = arith.constant 0 : index
    %c0_15 = arith.constant 0 : index
    %50 = vector.load %arg4[%c0_14, %c0_15] : memref<1x128xf32, #tpu.memory_space<vmem>>, vector<1x128xf32>
    tpu.vector_store %arg4[%c0_14, %c0_15], %49 {strides = array<i32>} : memref<1x128xf32, #tpu.memory_space<vmem>>, vector<1x128xf32>,
    return
  }
  func.func @transform_0(%arg0: i32) -> (i32, i32) {
    %c0_i32 = arith.constant 0 : i32
    %c0_i32_0 = arith.constant 0 : i32
    return %c0_i32, %arg0 : i32, i32
  }
  func.func @transform_1(%arg0: i32) -> (i32, i32) {
    %c0_i32 = arith.constant 0 : i32
    %c0_i32_0 = arith.constant 0 : i32
    return %c0_i32, %arg0 : i32, i32
  }
  func.func @transform_2(%arg0: i32) -> (i32, i32) {
    %c0_i32 = arith.constant 0 : i32
    %c0_i32_0 = arith.constant 0 : i32
    return %c0_i32, %arg0 : i32, i32
  }
  func.func @transform_3(%arg0: i32) -> (i32, i32) {
    %c0_i32 = arith.constant 0 : i32
    %c0_i32_0 = arith.constant 0 : i32
    return %c0_i32, %arg0 : i32, i32
  }
}

</mosaic_0001>

<bundles_post_ra>
// kernel: tpu_custom_call.1
= control target key start
LH: loop header
LB: loop body
LE: loop exit
PB: predicated region body
PF: predicated region fallthrough
CT: control target
= control target key end

     0   :  { %9 = vsyncpa [#allocation3], 0  ;;  %s1070_s0 = inlined_call_operand.vmem [shape: f32[300,20], index: 0, kind: input, shape index: {}]   ;;  %s1071_s1 = inlined_call_operand.vmem [shape: s32[1,300], index: 1, kind: input, shape index: {}]   ;;  %s1072_s2 = inlined_call_operand.hbm [shape: f32[1,256], index: 2, kind: output, shape index: {0}]   ;;  %s1073_s3 = inlined_call_operand.hbm [shape: f32[1,256], index: 3, kind: output, shape index: {1}]  }
   0x1   :  { %11 = vsyncpa [#allocation3 + $0x1], 0 }
   0x2   :  { %12 = vsyncpa [#allocation5], 0 }
   0x3   :  { %14 = vsyncpa [#allocation5 + $0x1], 0  ;;  %s827_s12 = smov 0   ;;  %s829_s13 = smov 0  }
   0x4   :  { %s831_s14 = smov 0   ;;  %s833_s15 = smov 0  }
   0x5 LB: > { %s848_s16 = sadd.s32 4294967295, %s801_s15   ;;  %s627_s17 = sadd.s32 4294967294, %s801_s15   ;;  %s801_s15 = sphi %s833_s15, %s1083_s15   ;;  %s797_s14 = sphi %s831_s14, %s1082_s14   ;;  %s793_s13 = sphi %s829_s13, %s1081_s13   ;;  %s789_s12 = sphi %s827_s12, %s1080_s12  }
   0x6   : > { %s852_s18 = sadd.s32 1, %s801_s15   ;;  %s79_s19 = sadd.s32 1, %s797_s14 }
   0x7   : > { %s76_s20 = ssub.s32 %s801_s15, %s852_s18  ;;  %p89_p0 = scmp.ne.s32.totalorder %s797_s14, %s793_s13 }
   0x8   : > { %p77_p1 = scmp.eq.s32.totalorder %s76_s20, 0  ;;  %p90_p2 = scmp.eq.s32.totalorder %s848_s16, 1 }
   0x9   : > { %p95_p3 = scmp.ne.s32.totalorder %s793_s13, %s789_s12  ;;  %p96_p4 = scmp.eq.s32.totalorder %s627_s17, 1 }
   0xa   : > { %s863_s21 = scalar_select %p77_p1, %s797_s14, %s79_s19  }
   0xb   : > { %p865_p5 = por %p90_p2, %p89_p0  ;;  %p869_p6 = por %p96_p4, %p95_p3 }
   0xc   : > { %p630_p7 = scmp.ge.s32.totalorder %s801_s15, 1  ;;  %p173_p8 = scmp.lt.s32.totalorder %s801_s15, 3 }
   0xe   : > { %p174_p9 = pnand %p630_p7, %p173_p8 }
   0xf   : > { %s631_s24 = sshll.u32 (!%p174_p9), %s848_s16, 5  ;;  %s633_s25 = sshll.u32 (!%p174_p9), %s848_s16, 1  ;;  %v337_v0 = vlaneseq (!%p174_p9)  ;;  %v803_v20 = vmov (!%p174_p9), 0   ;;  %vm488_vm13 = vcmask (!%p174_p9), 1040384   ;;  %v804_v56 = vmov (!%p174_p9), 0.0  }
  0x10   : > { %177 = sbr.rel (%p174_p9) target bundleno = 414 (0x19e), region = 28  ;;  %p217_p10 = scmp.lt.s32.totalorder (!%p174_p9), %s631_s24, 37  ;;  %vm369_vm14 = vcmask (!%p174_p9), 1043456  }
  0x11   : > { %p231_p11 = scmp.lt.s32.totalorder (!%p174_p9), %s633_s25, 2  ;;  %v338_v3 = vand.u32 (!%p174_p9), 127, %v337_v0  ;;  %s634_s30 = sshll.u32 (!%p174_p9), %s848_s16, 8  ;;  %v887_v7 = vshrl.u32 (!%p174_p9), %v337_v0, 7 }
  0x12   : > { %v340_v10 = vstv (!%p174_p9), %s634_s30  ;;  %s993_s7 = sand.u32 (!%p174_p9), 1, %s793_s13   ;;  %s637_s10 = sshll.u32 (!%p174_p9), %s848_s16, 4 }
  0x13   : > { %v339_v6 = vadd.s32 (!%p174_p9), 128, %v338_v3  ;;  %v349_v12 = vsub.s32 (!%p174_p9), 0, %v887_v7  ;;  %v353_v13 = vsub.s32 (!%p174_p9), 1, %v887_v7  ;;  %v341_v17 = vadd.s32 (!%p174_p9), %v340_v10, %v338_v3  ;;  %s211_s8 = scalar_lea.vmem (!%p174_p9), [#allocation4], %s993_s7  ;;  %s533_s19 = scalar_lea.hbm (!%p174_p9), %s1073_s3, %s637_s10 }
  0x14   : > { %v905_v27 = vadd.s32 (!%p174_p9), 8, %v887_v7  ;;  %v908_v28 = vadd.s32 (!%p174_p9), 16, %v887_v7  ;;  %s535_s9 = sshll.u32 (!%p174_p9), %s211_s8, 4  ;;  %s510_s20 = scalar_lea.sflag (!%p174_p9), [#allocation5], %s993_s7  ;;  %s996_s9 = int_to_ptr.vmem [resolvable:$true] %s535_s9 }
  0x15   : > { %v342_v11 = vadd.s32 (!%p174_p9), %v340_v10, %v339_v6  ;;  %vm343_vm2 = vcmp.lt.s32.totalorder (!%p174_p9), %v341_v17, 300 }
  0x17   : > { %s1085_s24 = smov (!%p217_p10, %s631_s24), 37  ;;  %s1087_s25 = smov (!%p231_p11, %s633_s25), 2  ;;  %vm344_vm1 = vcmp.lt.s32.totalorder %v342_v11, 300 }
  0x18   : > { %s632_s26 = sshll.u32 %s1085_s24, 3  ;;  %s233_s6 = scalar_lea.vmem %s1071_s1, %s1087_s25 }
  0x19   : > { %s880_s29 = scalar_lea.vmem %s1070_s0, %s632_s26  ;;  %v335_v16 = vld [vmem:[%s233_s6] sm:$0x3]  ;;  %s707_s24 = scalar_lea.vmem %s996_s9, 16 }
  0x1a   : > { %v255_v1 = vld [vmem:[%s880_s29 + $0x80] sm:$0xff]  ;;  %v256_v4 = vld [vmem:[%s880_s29 + $0x88] sm:$0xff]  ;;  %v257_v8 = vld [vmem:[%s880_s29 + $0x90] sm:$0xff]  ;;  %vm345_vm0 = vcmp.ge.s32.totalorder %v335_v16, 0  ;;  %v366_v18 = vrot.slane %v335_v16, %v353_v13  ;;  %v362_v19 = vrot.slane %v335_v16, %v349_v12  ;;  %p708_p12 = scmp.ne.s32.totalorder %s996_s9, %s707_s24  ;;  %s805_s25 = smov [#allocation4]  }
  0x1b   : > { %v239_v2 = vld [vmem:[%s880_s29] sm:$0xff]  ;;  %303 = vxpose.xlu1.b32.start [1/16] (narrow) %v255_v1, 24  ;;  %v240_v5 = vld [vmem:[%s880_s29 + $0x8] sm:$0xff]  ;;  %v241_v9 = vld [vmem:[%s880_s29 + $0x10] sm:$0xff]  ;;  %v346_v21 = vsel %vm345_vm0, 1, %v803_v20  ;;  %s711_s26 = sshll.u32 %s805_s25, 4  ;;  %s712_s26 = int_to_ptr.vmem [resolvable:$false] %s711_s26 }
  0x1c   : > { %271 = vxpose.xlu0.b32.start [1/16] (narrow) %v239_v2, 24  ;;  %v258_v14 = vld [vmem:[%s880_s29 + $0x98] sm:$0xff]  ;;  %v354_v22 = vrot.slane %v346_v21, %v353_v13  ;;  %v350_v23 = vrot.slane %v346_v21, %v349_v12  ;;  %v259_v24 = vld [vmem:[%s880_s29 + $0xa0] sm:$0xff]  ;;  %v260_v31 = vld [vmem:[%s880_s29 + $0xa8] sm:$0xff]  ;;  %p709_p13 = pnand %p708_p12, %p865_p5  ;;  %s713_s27 = scalar_lea.vmem %s712_s26, 32 }
  0x1d   : > { %v242_v15 = vld [vmem:[%s880_s29 + $0x18] sm:$0xff]  ;;  %v243_v25 = vld [vmem:[%s880_s29 + $0x20] sm:$0xff]  ;;  %v244_v32 = vld [vmem:[%s880_s29 + $0x28] sm:$0xff]  ;;  %p714_p1 = scmp.lt.s32.totalorder %s996_s9, %s712_s26  ;;  %p715_p2 = scmp.lt.s32.totalorder %s713_s27, %s707_s24 }
  0x1e   : > { %vm356_vm3 = vcmp.ne.s32.totalorder %v354_v22, 0  ;;  %vm355_vm4 = vcmp.ne.s32.totalorder %v350_v23, 0  ;;  %v261_v36 = vld [vmem:[%s880_s29 + $0xb0] sm:$0xff]  ;;  %v262_v38 = vld [vmem:[%s880_s29 + $0xb8] sm:$0xff]  ;;  %v263_v40 = vld [vmem:[%s880_s29 + $0xc0] sm:$0xff]  ;;  %p710_p0 = pneg %p709_p13 }
  0x1f   : > { %304 = vxpose.xlu1.b32.cont [2/16] (narrow) %v256_v4, 24  ;;  %vm900_vm5 = vmand %vm344_vm1, %vm356_vm3  ;;  %v245_v37 = vld [vmem:[%s880_s29 + $0x30] sm:$0xff]  ;;  %v246_v39 = vld [vmem:[%s880_s29 + $0x38] sm:$0xff]  ;;  %p716_p3 = por %p715_p2, %p714_p1 }
  0x20   : > { %272 = vxpose.xlu0.b32.cont [2/16] (narrow) %v240_v5, 24  ;;  %v368_v29 = vsel %vm900_vm5, %v366_v18, 0  ;;  %vm912_vm6 = vmand %vm343_vm2, %vm355_vm4  ;;  %v247_v41 = vld [vmem:[%s880_s29 + $0x40] sm:$0xff]  ;;  %v264_v42 = vld [vmem:[%s880_s29 + $0xc8] sm:$0xff]  ;;  %v636_v58 = vsel %vm900_vm5, 1.0, %v804_v56 }
  0x21   : > { %v918_v33 = vrot.slane %v368_v29, %v349_v12  ;;  %v367_v34 = vsel %vm912_vm6, %v362_v19, 0  ;;  %v248_v43 = vld [vmem:[%s880_s29 + $0x48] sm:$0xff]  ;;  %v265_v44 = vld [vmem:[%s880_s29 + $0xd0] sm:$0xff]  ;;  %v266_v46 = vld [vmem:[%s880_s29 + $0xd8] sm:$0xff]  ;;  %v635_v57 = vsel %vm912_vm6, 1.0, %v804_v56  ;;  %v499_v60 = vsel %vm488_vm13, %v636_v58, 0.0  ;;  %p717_p4 = pnand %p716_p3, %p710_p0 }
  0x22   : > { %v922_v35 = vrot.slane %v367_v34, %v349_v12  ;;  %v249_v45 = vld [vmem:[%s880_s29 + $0x50] sm:$0xff]  ;;  %v250_v47 = vld [vmem:[%s880_s29 + $0x58] sm:$0xff]  ;;  %v267_v48 = vld [vmem:[%s880_s29 + $0xe0] sm:$0xff]  ;;  %v498_v59 = vsel %vm488_vm13, %v635_v57, 0.0 }
  0x23   : > { %305 = vxpose.xlu1.b32.cont [3/16] (narrow) %v257_v8, 24  ;;  %vm443_vm7 = vcmp.eq.s32.totalorder %v887_v7, %v918_v33  ;;  %vm445_vm8 = vcmp.eq.s32.totalorder %v905_v27, %v918_v33  ;;  %vm447_vm9 = vcmp.eq.s32.totalorder %v908_v28, %v918_v33  ;;  %v251_v49 = vld [vmem:[%s880_s29 + $0x60] sm:$0xff]  ;;  %v268_v50 = vld [vmem:[%s880_s29 + $0xe8] sm:$0xff]  ;;  %v269_v52 = vld [vmem:[%s880_s29 + $0xf0] sm:$0xff]  ;;  %v500_v61 = vadd.f32 %v499_v60, %v498_v59 }
  0x24   : > { %273 = vxpose.xlu0.b32.cont [3/16] (narrow) %v241_v9, 24  ;;  %vm442_vm10 = vcmp.eq.s32.totalorder %v887_v7, %v922_v35  ;;  %vm444_vm11 = vcmp.eq.s32.totalorder %v905_v27, %v922_v35  ;;  %vm446_vm12 = vcmp.eq.s32.totalorder %v908_v28, %v922_v35  ;;  %v252_v51 = vld [vmem:[%s880_s29 + $0x68] sm:$0xff]  ;;  %v253_v53 = vld [vmem:[%s880_s29 + $0x70] sm:$0xff]  ;;  %v270_v54 = vld [vmem:[%s880_s29 + $0xf8] sm:$0xff] }
  0x25   : > { %v254_v55 = vld [vmem:[%s880_s29 + $0x78] sm:$0xff] }
  0x27   : > { %306 = vxpose.xlu1.b32.cont [4/16] (narrow) %v258_v14, 24 }
  0x28   : > { %274 = vxpose.xlu0.b32.cont [4/16] (narrow) %v242_v15, 24 }
  0x2b   : > { %307 = vxpose.xlu1.b32.cont [5/16] (narrow) %v259_v24, 24 }
  0x2c   : > { %275 = vxpose.xlu0.b32.cont [5/16] (narrow) %v243_v25, 24 }
  0x2f   : > { %308 = vxpose.xlu1.b32.cont [6/16] (narrow) %v260_v31, 24 }
  0x30   : > { %276 = vxpose.xlu0.b32.cont [6/16] (narrow) %v244_v32, 24 }
  0x33   : > { %309 = vxpose.xlu1.b32.cont [7/16] (narrow) %v261_v36, 24 }
  0x34   : > { %277 = vxpose.xlu0.b32.cont [7/16] (narrow) %v245_v37, 24 }
  0x37   : > { %310 = vxpose.xlu1.b32.cont [8/16] (narrow) %v262_v38, 24 }
  0x38   : > { %278 = vxpose.xlu0.b32.cont [8/16] (narrow) %v246_v39, 24 }
  0x3b   : > { %311 = vxpose.xlu1.b32.cont [9/16] (narrow) %v263_v40, 24 }
  0x3c   : > { %279 = vxpose.xlu0.b32.cont [9/16] (narrow) %v247_v41, 24 }
  0x3f   : > { %312 = vxpose.xlu1.b32.cont [10/16] (narrow) %v264_v42, 24 }
  0x40   : > { %280 = vxpose.xlu0.b32.cont [10/16] (narrow) %v248_v43, 24 }
  0x43   : > { %313 = vxpose.xlu1.b32.cont [11/16] (narrow) %v265_v44, 24 }
  0x44   : > { %281 = vxpose.xlu0.b32.cont [11/16] (narrow) %v249_v45, 24 }
  0x47   : > { %314 = vxpose.xlu1.b32.cont [12/16] (narrow) %v266_v46, 24 }
  0x48   : > { %282 = vxpose.xlu0.b32.cont [12/16] (narrow) %v250_v47, 24 }
  0x4b   : > { %315 = vxpose.xlu1.b32.cont [13/16] (narrow) %v267_v48, 24 }
  0x4c   : > { %283 = vxpose.xlu0.b32.cont [13/16] (narrow) %v251_v49, 24 }
  0x4f   : > { %316 = vxpose.xlu1.b32.cont [14/16] (narrow) %v268_v50, 24 }
  0x50   : > { %284 = vxpose.xlu0.b32.cont [14/16] (narrow) %v252_v51, 24 }
  0x53   : > { %317 = vxpose.xlu1.b32.cont [15/16] (narrow) %v269_v52, 24 }
  0x54   : > { %285 = vxpose.xlu0.b32.cont [15/16] (narrow) %v253_v53, 24 }
  0x57   : > { %318 = vxpose.xlu1.b32.end [16/16] (narrow) %v270_v54, 24 }
  0x58   : > { %286 = vxpose.xlu0.b32.end [16/16] (narrow) %v254_v55, 24 }
  0x7e   : > { %501 = vadd.xlane.f32.xlu1 %v500_v61 }
  0x9b   : > { %v319_v62 = vpop.trf.xlu1 }
  0x9c   : > { %v287_v63 = vpop.trf.xlu0  ;;  %v449_v2 = vsel %vm443_vm7, %v319_v62, 0.0 }
  0x9d   : > { %v448_v3 = vsel %vm442_vm10, %v287_v63, 0.0 }
  0x9f   : > { %v320_v0 = vpop.trf.xlu1 }
  0xa0   : > { %v288_v1 = vpop.trf.xlu0  ;;  %v451_v4 = vsel %vm445_vm8, %v320_v0, 0.0 }
  0xa1   : > { %v450_v5 = vsel %vm444_vm11, %v288_v1, 0.0  ;;  %v463_v6 = vadd.f32 %v451_v4, %v449_v2 }
  0xa2   : > { %v454_v8 = vadd.f32 %v450_v5, %v448_v3 }
  0xa3   : > { %v321_v9 = vpop.trf.xlu1 }
  0xa4   : > { %v289_v10 = vpop.trf.xlu0  ;;  %v379_v11 = vsel %vm369_vm14, %v321_v9, -inf  ;;  %v453_v7 = vsel %vm447_vm9, %v321_v9, 0.0 }
  0xa5   : > { %v370_v12 = vsel %vm369_vm14, %v289_v10, -inf  ;;  %v452_v13 = vsel %vm446_vm12, %v289_v10, 0.0  ;;  %v380_v14 = vmax.f32 %v319_v62, %v379_v11  ;;  %v464_v15 = vsel %vm369_vm14, %v453_v7, 0.0 }
  0xa6   : > { %v371_v16 = vmax.f32 %v287_v63, %v370_v12  ;;  %v455_v17 = vsel %vm369_vm14, %v452_v13, 0.0  ;;  %v465_v18 = vadd.f32 %v464_v15, %v463_v6 }
  0xa7   : > { %v456_v19 = vadd.f32 %v455_v17, %v454_v8  ;;  %v381_v20 = vmax.f32 %v380_v14, %v320_v0 }
  0xa8   : > { %v372_v21 = vmax.f32 %v371_v16, %v288_v1 }
  0xa9   : > { %v382_v22 = vrot.slane %v381_v20, 4  ;;  %v457_v4 = vrot.slane %v456_v19, 4 }
  0xaa   : > { %v373_v23 = vrot.slane %v372_v21, 4 }
  0xab   : > { %v383_v24 = vmax.f32 %v381_v20, %v382_v22  ;;  %v458_v11 = vadd.f32 %v457_v4, %v456_v19 }
  0xac   : > { %v374_v25 = vmax.f32 %v372_v21, %v373_v23 }
  0xad   : > { %v384_v27 = vrot.slane %v383_v24, 2  ;;  %v459_v13 = vrot.slane %v458_v11, 2 }
  0xae   : > { %v375_v29 = vrot.slane %v374_v25, 2 }
  0xaf   : > { %v385_v31 = vmax.f32 %v383_v24, %v384_v27  ;;  %v460_v15 = vadd.f32 %v459_v13, %v458_v11 }
  0xb0   : > { %v376_v32 = vmax.f32 %v374_v25, %v375_v29 }
  0xb1   : > { %v386_v28 = vrot.slane %v385_v31, 1  ;;  %v461_v21 = vrot.slane %v460_v15, 1 }
  0xb2   : > { %v377_v33 = vrot.slane %v376_v32, 1 }
  0xb3   : > { %v387_v34 = vmax.f32 %v385_v31, %v386_v28  ;;  %v462_v29 = vadd.f32 %v461_v21, %v460_v15 }
  0xb4   : > { %v378_v35 = vmax.f32 %v376_v32, %v377_v33 }
  0xb5   : > { %v389_v36 = vsub.f32 %v319_v62, %v387_v34  ;;  %v391_v37 = vsub.f32 %v320_v0, %v387_v34  ;;  %v393_v38 = vsub.f32 %v321_v9, %v387_v34  ;;  %v466_v0 = vrot.slane %v465_v18, 4 }
  0xb6   : > { %v388_v39 = vsub.f32 %v287_v63, %v378_v35  ;;  %v390_v40 = vsub.f32 %v288_v1, %v378_v35  ;;  %v392_v41 = vsub.f32 %v289_v10, %v378_v35 }
  0xb7   : > { %v396_v42 = vmul.f32 1.442695, %v389_v36  ;;  %v400_v43 = vmul.f32 1.442695, %v391_v37  ;;  %v404_v44 = vmul.f32 1.442695, %v393_v38  ;;  %v467_v6 = vadd.f32 %v466_v0, %v465_v18 }
  0xb8   : > { %v394_v45 = vmul.f32 1.442695, %v388_v39  ;;  %v398_v46 = vmul.f32 1.442695, %v390_v40  ;;  %v402_v47 = vmul.f32 1.442695, %v392_v41 }
  0xb9   : > { %687 = vpow2.f32 %v396_v42  ;;  %v468_v7 = vrot.slane %v467_v6, 2 }
  0xba   : > { %689 = vpow2.f32 %v400_v43 }
  0xbb   : > { %691 = vpow2.f32 %v404_v44  ;;  %v469_v14 = vadd.f32 %v468_v7, %v467_v6 }
  0xbc   : > { %693 = vpow2.f32 %v394_v45 }
  0xbd   : > { %695 = vpow2.f32 %v398_v46  ;;  %v470_v16 = vrot.slane %v469_v14, 1 }
  0xbe   : > { %697 = vpow2.f32 %v402_v47 }
  0xbf   : > { %v471_v24 = vadd.f32 %v470_v16, %v469_v14 }
  0xc3   : > { %v688_v48 = vpop.eup %687 }
  0xc4   : > { %v690_v49 = vpop.eup %689 }
  0xc5   : > { %v692_v50 = vpop.eup %691  ;;  %v415_v51 = vadd.f32 %v690_v49, %v688_v48 }
  0xc6   : > { %v694_v52 = vpop.eup %693  ;;  %v416_v53 = vsel %vm369_vm14, %v692_v50, 0.0 }
  0xc7   : > { %v696_v54 = vpop.eup %695  ;;  %v417_v55 = vadd.f32 %v416_v53, %v415_v51 }
  0xc8   : > { %v698_v56 = vpop.eup %697  ;;  %v406_v57 = vadd.f32 %v696_v54, %v694_v52 }
  0xc9   : > { %v418_v58 = vrot.slane %v417_v55, 4  ;;  %v407_v59 = vsel %vm369_vm14, %v698_v56, 0.0 }
  0xca   : > { %v408_v60 = vadd.f32 %v407_v59, %v406_v57 }
  0xcb   : > { %v419_v61 = vadd.f32 %v418_v58, %v417_v55 }
  0xcc   : > { %v409_v62 = vrot.slane %v408_v60, 4 }
  0xcd   : > { %v420_v63 = vrot.slane %v419_v61, 2 }
  0xce   : > { %v410_v1 = vadd.f32 %v409_v62, %v408_v60 }
  0xcf   : > { %v421_v2 = vadd.f32 %v420_v63, %v419_v61 }
  0xd0   : > { %v411_v3 = vrot.slane %v410_v1, 2 }
  0xd1   : > { %v422_v5 = vrot.slane %v421_v2, 1 }
  0xd2   : > { %v412_v8 = vadd.f32 %v411_v3, %v410_v1 }
  0xd3   : > { %v423_v9 = vadd.f32 %v422_v5, %v421_v2 }
  0xd4   : > { %v413_v10 = vrot.slane %v412_v8, 1 }
  0xd5   : > { %699 = vlog2.f32 %v423_v9 }
  0xd6   : > { %v414_v12 = vadd.f32 %v413_v10, %v412_v8 }
  0xd8   : > { %701 = vlog2.f32 %v414_v12 }
  0xdf   : > { %v700_v17 = vpop.eup %699 }
  0xe0   : > { %v427_v20 = vmul.f32 0.6931472, %v700_v17 }
  0xe2   : > { %v702_v22 = vpop.eup %701  ;;  %v429_v23 = vadd.f32 %v427_v20, %v387_v34 }
  0xe3   : > { %v425_v25 = vmul.f32 0.6931472, %v702_v22 }
  0xe4   : > { %v473_v18 = vsub.f32 %v471_v24, %v429_v23 }
  0xe5   : > { %v428_v27 = vadd.f32 %v425_v25, %v378_v35 }
  0xe6   : > { %v476_v31 = vmul.f32 1.442695, %v473_v18 }
  0xe7   : > { %v472_v19 = vsub.f32 %v462_v29, %v428_v27 }
  0xe8   : > { %703 = vpow2.f32 %v476_v31 }
  0xe9   : > { %v474_v32 = vmul.f32 1.442695, %v472_v19 }
  0xeb   : > { %705 = vpow2.f32 %v474_v32 }
  0xf2   : > { %v704_v28 = vpop.eup %703 }
  0xf3   : > { %v479_v33 = vsub.f32 1.0, %v704_v28 }
  0xf5   : > { %v706_v36 = vpop.eup %705  ;;  %v481_v37 = vmul.f32 %v479_v33, %v479_v33 }
  0xf6   : > { %v478_v38 = vsub.f32 1.0, %v706_v36 }
  0xf7   : > { %v483_v39 = vsub.f32 0.0, %v481_v37 }
  0xf8   : > { %v480_v40 = vmul.f32 %v478_v38, %v478_v38 }
  0xf9   : > { %v485_v34 = vmul.f32 %v483_v39, %v473_v18 }
  0xfa   : > { %v482_v41 = vsub.f32 0.0, %v480_v40 }
  0xfb   : > { %v487_v35 = vsel %vm900_vm5, %v485_v34, 0.0 }
  0xfc   : > { %v484_v42 = vmul.f32 %v482_v41, %v472_v19  ;;  %v490_v43 = vsel %vm488_vm13, %v487_v35, 0.0 }
  0xfe   : > { %v486_v44 = vsel %vm912_vm6, %v484_v42, 0.0 }
  0xff   : > { %v489_v45 = vsel %vm488_vm13, %v486_v44, 0.0 }
 0x100   : > { %v491_v46 = vadd.f32 %v490_v43, %v489_v45 }
 0x102   : > { %492 = vadd.xlane.f32.xlu0 %v491_v46 }
 0x10b   : > { %v502_v47 = vpop.xlane.xlu1 %501 }
 0x10c   : > { %504 = vst [vmem:[%s211_s8] sm:$0x1] %v502_v47 }
 0x10d   : > { %720 = shalt.err (!%p717_p4)
}
 0x10e   : > { %s721_s28 = scalar_lea.hbm %s533_s19, 16  ;;  %s725_s4 = scalar_lea.hbm %s1073_s3, 32 }
 0x10f   : > { %p722_p7 = scmp.ne.s32.totalorder %s533_s19, %s721_s28  ;;  %p726_p10 = scmp.lt.u32.totalorder %s533_s19, %s1073_s3 }
 0x110   : > { %p727_p11 = scmp.lt.u32.totalorder %s725_s4, %s721_s28  ;;  %p729_p13 = scmp.lt.u32.totalorder %s721_s28, %s533_s19 }
 0x111   : > { %p723_p8 = pnand %p722_p7, %p865_p5 }
 0x112   : > { %p728_p12 = por %p727_p11, %p726_p10 }
 0x113   : > { %p724_p9 = pneg %p723_p8 }
 0x114   : > { %p730_p1 = por %p729_p13, %p728_p12 }
 0x116   : > { %p731_p0 = pnand %p730_p1, %p724_p9 }
 0x118   : > { %734 = shalt.err (!%p731_p0)
}
 0x119   : > { %642 = dma.vmem_to_hbm [thread:$0]  (%p865_p5), %s996_s9, 16, %s533_s19, %s510_s20  }
 0x11a   : > { %s205_s8 = scalar_lea.vmem [#allocation2], %s993_s7  ;;  %s1029_s25 = scalar_lea.hbm %s1072_s2, %s637_s10 }
 0x11b   : > { %s522_s11 = sshll.u32 %s205_s8, 4  ;;  %s506_s26 = scalar_lea.sflag [#allocation3], %s993_s7  ;;  %s1022_s11 = int_to_ptr.vmem [resolvable:$true] %s522_s11 }
 0x11c   : > { %s735_s27 = scalar_lea.vmem %s1022_s11, 16  ;;  %s806_s9 = smov [#allocation2]  }
 0x11d   : > { %p736_p2 = scmp.ne.s32.totalorder %s1022_s11, %s735_s27  ;;  %s739_s19 = sshll.u32 %s806_s9, 4  ;;  %s740_s19 = int_to_ptr.vmem [resolvable:$false] %s739_s19 }
 0x11e   : > { %s741_s16 = scalar_lea.vmem %s740_s19, 32  ;;  %p742_p7 = scmp.lt.s32.totalorder %s1022_s11, %s740_s19 }
 0x11f   : > { %p737_p3 = pnand %p736_p2, %p865_p5  ;;  %p743_p8 = scmp.lt.s32.totalorder %s741_s16, %s735_s27 }
 0x121   : > { %p738_p4 = pneg %p737_p3  ;;  %p744_p9 = por %p743_p8, %p742_p7 }
 0x123   : > { %p745_p10 = pnand %p744_p9, %p738_p4 }
 0x18f   : > { %v493_v26 = vpop.xlane.xlu0 %492 }
 0x190   : > { %503 = vst [vmem:[%s205_s8] sm:$0x1] %v493_v26 }
 0x191   : > { %748 = shalt.err (!%p745_p10)
}
 0x192   : > { %s749_s7 = scalar_lea.hbm %s1029_s25, 16  ;;  %s753_s28 = scalar_lea.hbm %s1072_s2, 32 }
 0x193   : > { %p750_p11 = scmp.ne.s32.totalorder %s1029_s25, %s749_s7  ;;  %p754_p1 = scmp.lt.u32.totalorder %s1029_s25, %s1072_s2 }
 0x194   : > { %p755_p0 = scmp.lt.u32.totalorder %s753_s28, %s749_s7  ;;  %p757_p3 = scmp.lt.u32.totalorder %s749_s7, %s1029_s25 }
 0x195   : > { %p751_p12 = pnand %p750_p11, %p865_p5 }
 0x196   : > { %p756_p2 = por %p755_p0, %p754_p1 }
 0x197   : > { %p752_p13 = pneg %p751_p12 }
 0x198   : > { %p758_p4 = por %p757_p3, %p756_p2 }
 0x19a   : > { %p759_p7 = pnand %p758_p4, %p752_p13 }
 0x19c   : > { %762 = shalt.err (!%p759_p7)
}
 0x19d   : > { %641 = dma.vmem_to_hbm [thread:$0]  (%p865_p5), %s1022_s11, 16, %s1029_s25, %s506_s26  }
 0x19e PF: > { %p652_p8 = scmp.ge.s32.totalorder %s801_s15, 2  ;;  %s547_s4 = sand.u32 1, %s789_s12  }
 0x19f   : > { %s548_s5 = scalar_lea.sflag [#allocation3], %s547_s4 }
 0x1a0   : > { %p646_p9 = pnand %p652_p8, %p869_p6 }
 0x1a2   : > { %780 = dma.done.wait (!%p646_p9), %s548_s5, 16  }
 0x1a3   : > { %782 = vsyncadd (!%p646_p9), %s548_s5, 4294967280  ;;  %s556_s6 = scalar_lea.sflag [#allocation5], %s547_s4 }
 0x1a4   : > { %784 = dma.done.wait (!%p646_p9), %s556_s6, 16  }
 0x1a5   : > { %786 = vsyncadd (!%p646_p9), %s556_s6, 4294967280  ;;  %p17_p5 = scmp.ge.s32.totalorder %s852_s18, 4   ;;  %s1080_s12 = smov %s793_s13 }
 0x1a6   : > { %s1081_s13 = smov %s797_s14  ;;  %s1082_s14 = smov %s863_s21 }
 0x1a7   : > { %s1083_s15 = smov %s852_s18  ;;  %19 = sbr.rel (!%p17_p5) target bundleno = 5 (0x5), region = 83 }
 0x1ae   :  { %560 = vsyncpa [#allocation3], 1 }
 0x1af   :  { %562 = vsyncpa [#allocation3 + $0x1], 1 }
 0x1b0   :  { %563 = vsyncpa [#allocation5], 1 }
 0x1b1   :  { %565 = vsyncpa [#allocation5 + $0x1], 1 }

// kernel: tpu_custom_call.1
= control target key start
LH: loop header
LB: loop body
LE: loop exit
PB: predicated region body
PF: predicated region fallthrough
CT: control target
= control target key end

     0   :  { %9 = vsyncpa [#allocation3], 0  ;;  %s1085_s0 = inlined_call_operand.hbm [shape: f32[20,300], index: 0, kind: input, shape index: {}]   ;;  %s1086_s1 = inlined_call_operand.vmem [shape: s32[1,300], index: 1, kind: input, shape index: {}]   ;;  %s1087_s2 = inlined_call_operand.hbm [shape: f32[1,256], index: 2, kind: output, shape index: {0}]   ;;  %s1088_s3 = inlined_call_operand.hbm [shape: f32[1,256], index: 3, kind: output, shape index: {1}]  }
   0x1   :  { %11 = vsyncpa [#allocation3 + $0x1], 0 }
   0x2   :  { %12 = vsyncpa [#allocation4], 0 }
   0x3   :  { %14 = vsyncpa [#allocation4 + $0x1], 0 }
   0x4   :  { %15 = vsyncpa [#allocation7], 0 }
   0x5   :  { %17 = vsyncpa [#allocation7 + $0x1], 0  ;;  %s803_s12 = smov 0   ;;  %s805_s13 = smov 0  }
   0x6   :  { %s807_s14 = smov 0   ;;  %s809_s15 = smov 0  }
   0x7 LB: > { %s824_s16 = sadd.s32 4294967295, %s774_s15   ;;  %s558_s17 = sadd.s32 4294967294, %s774_s15   ;;  %s774_s15 = sphi %s809_s15, %s1102_s15   ;;  %s770_s14 = sphi %s807_s14, %s1101_s14   ;;  %s766_s13 = sphi %s805_s13, %s1100_s13   ;;  %s762_s12 = sphi %s803_s12, %s1099_s12  }
   0x8   : > { %s828_s18 = sadd.s32 1, %s774_s15   ;;  %s30_s19 = sadd.s32 1, %s770_s14 }
   0x9   : > { %s27_s20 = ssub.s32 %s774_s15, %s828_s18  ;;  %p37_p0 = scmp.ne.s32.totalorder %s770_s14, %s766_s13 }
   0xa   : > { %p28_p1 = scmp.eq.s32.totalorder %s27_s20, 0  ;;  %p38_p2 = scmp.eq.s32.totalorder %s774_s15, 0 }
   0xb   : > { %p43_p3 = scmp.ne.s32.totalorder %s766_s13, %s762_s12  ;;  %p44_p4 = scmp.eq.s32.totalorder %s824_s16, 0 }
   0xc   : > { %s840_s21 = scalar_select %p28_p1, %s770_s14, %s30_s19  }
   0xd   : > { %p39_p5 = por %p38_p2, %p37_p0  ;;  %p842_p6 = por %p44_p4, %p43_p3 }
   0xe   : > { %p93_p7 = scmp.eq.s32.totalorder %s824_s16, 1  ;;  %p99_p8 = scmp.eq.s32.totalorder %s558_s17, 1 }
   0xf   : > { %p1089_p11 = scmp.ge.s32.totalorder %s774_s15, 2 }
  0x10   : > { %p847_p9 = por %p93_p7, %p37_p0  ;;  %p851_p10 = por %p99_p8, %p43_p3 }
  0x11   : > { %141 = sbr.rel (%p1089_p11) target bundleno = 60 (0x3c), region = 16 }
  0x12   : > { %s1092_s24 = scalar_select %p851_p10, 1, 0 }
  0x18   : > { %144 = sbr.rel (!%p39_p5) target bundleno = 60 (0x3c), region = 20  ;;  %s145_s25 = sand.u32 (%p39_p5), 1, %s770_s14  }
  0x19   : > { %s561_s26 = sshll.u32 (%p39_p5), %s774_s15, 1  ;;  %s577_s27 = smul.u32 (%p39_p5), 48, %s145_s25 }
  0x1a   : > { %s151_s28 = ssub.s32 (%p39_p5), 3, %s561_s26  ;;  %s866_s4 = scalar_lea.sflag (%p39_p5), [#allocation3], %s145_s25 }
  0x1b   : > { %p152_p12 = scmp.lt.s32.totalorder (%p39_p5), %s151_s28, 2  ;;  %s149_s5 = scalar_lea.vmem (%p39_p5), [#allocation2], %s577_s27 }
  0x1f   : > { %s1104_s28 = smov (!%p152_p12, %s151_s28), 2 }
  0x20   : > { %s863_s29 = smul.u32 384, %s1104_s28 }
  0x22   : > { %s156_s30 = ssub.s32 768, %s863_s29 }
  0x23   : > { %157 = vsyncadd %s866_s4, %s156_s30  ;;  %p562_p13 = scmp.ne.s32.totalorder %s863_s29, 0  ;;  %s576_s6 = sshll.u32 %s774_s15, 8 }
  0x24   : > { %s874_s9 = scalar_lea.hbm %s1085_s0, %s576_s6  ;;  %s564_s10 = sshll.u32 %s1104_s28, 3 }
  0x25   : > { %s163_s11 = sshll.u32 %s149_s5, 4  ;;  %s648_s17 = scalar_lea.hbm %s874_s9, %s863_s29  ;;  %s877_s11 = int_to_ptr.vmem [resolvable:$true] %s163_s11 }
  0x26   : > { %p649_p0 = scmp.ne.s32.totalorder %s874_s9, %s648_s17  ;;  %s652_s25 = scalar_lea.hbm %s1085_s0, 1152 }
  0x27   : > { %p653_p3 = scmp.lt.u32.totalorder %s874_s9, %s1085_s0  ;;  %p654_p4 = scmp.lt.u32.totalorder %s652_s25, %s648_s17 }
  0x28   : > { %p650_p1 = pnand %p649_p0, %p562_p13  ;;  %p656_p7 = scmp.lt.u32.totalorder %s648_s17, %s874_s9 }
  0x29   : > { %p655_p5 = por %p654_p4, %p653_p3 }
  0x2a   : > { %p651_p2 = pneg %p650_p1 }
  0x2b   : > { %p657_p8 = por %p656_p7, %p655_p5 }
  0x2d   : > { %p658_p12 = pnand %p657_p8, %p651_p2 }
  0x2f   : > { %661 = shalt.err (!%p658_p12)
}
  0x30   : > { %s662_s30 = scalar_lea.vmem %s877_s11, %s863_s29  ;;  %s776_s5 = smov [#allocation2]  }
  0x31   : > { %p663_p0 = scmp.ne.s32.totalorder %s877_s11, %s662_s30  ;;  %s666_s6 = sshll.u32 %s776_s5, 4  ;;  %s667_s6 = int_to_ptr.vmem [resolvable:$false] %s666_s6 }
  0x32   : > { %s668_s7 = scalar_lea.vmem %s667_s6, 1536  ;;  %p669_p10 = scmp.lt.s32.totalorder %s877_s11, %s667_s6 }
  0x33   : > { %p664_p1 = pnand %p663_p0, %p562_p13  ;;  %p670_p3 = scmp.lt.s32.totalorder %s668_s7, %s662_s30 }
  0x35   : > { %p665_p11 = pneg %p664_p1  ;;  %p671_p4 = por %p670_p3, %p669_p10 }
  0x37   : > { %p672_p5 = pnand %p671_p4, %p665_p11 }
  0x39   : > { %675 = shalt.err (!%p672_p5)
}
  0x3a   : > { %s777_s8 = smov 384   ;;  %s778_s17 = smov 256  }
  0x3b   : > { %169 = dma.hbm_to_vmem [thread:$0]  (%p562_p13), %s874_s9, %s863_s29, %s877_s11, %s866_s4, %s777_s8, %s778_s17, %s564_s10  }
  0x3c PF: > { %p567_p2 = scmp.ge.s32.totalorder %s774_s15, 1  ;;  %p187_p7 = scmp.lt.s32.totalorder %s774_s15, 3 }
  0x3e   : > { %p188_p10 = pnand %p567_p2, %p187_p7 }
  0x3f   : > { %s909_s19 = sand.u32 (!%p188_p10), 1, %s766_s13  }
  0x40   : > { %191 = sbr.rel (%p188_p10) target bundleno = 347 (0x15b), region = 28  ;;  %s194_s25 = scalar_lea.sflag (!%p188_p10), [#allocation3], %s909_s19 }
  0x41   : > { %s578_s20 = smul.u32 (!%p188_p10), 48, %s909_s19 }
  0x43   : > { %s197_s26 = scalar_lea.vmem (!%p188_p10), [#allocation2], %s578_s20 }
  0x47   : > { %749 = dma.done.wait (%p842_p6), %s194_s25, 768  }
  0x48   : > { %751 = vsyncadd (%p842_p6), %s194_s25, 4294966528  ;;  %s568_s28 = sshll.u32 %s824_s16, 1  ;;  %vm289_vm0 = vcmask 1043456   ;;  %v918_v0 = vld [vmem:[%s197_s26] sm:$0xff]  ;;  %v923_v1 = vld [vmem:[%s197_s26 + $0x8] sm:$0xff]  ;;  %v257_v4 = vlaneseq  ;;  %s569_s22 = sshll.u32 %s824_s16, 8 }
  0x49   : > { %p241_p11 = scmp.lt.s32.totalorder %s568_s28, 2  ;;  %v925_v2 = vld [vmem:[%s197_s26 + $0x20] sm:$0xf]  ;;  %v927_v3 = vld [vmem:[%s197_s26 + $0x28] sm:$0xf]  ;;  %v929_v5 = vld [vmem:[%s197_s26 + $0x10] sm:$0xff]  ;;  %v260_v18 = vstv %s569_s22 }
  0x4a   : > { %v290_v6 = vsel %vm289_vm0, %v925_v2, -inf  ;;  %v299_v7 = vsel %vm289_vm0, %v927_v3, -inf  ;;  %v935_v8 = vld [vmem:[%s197_s26 + $0x18] sm:$0xff]  ;;  %v939_v12 = vshrl.u32 %v257_v4, 7  ;;  %v258_v14 = vand.u32 127, %v257_v4  ;;  %s224_s10 = scalar_lea.vmem [#allocation5], %s909_s19 }
  0x4b   : > { %s1106_s28 = smov (!%p241_p11, %s568_s28), 2  ;;  %v291_v9 = vmax.f32 %v918_v0, %v290_v6  ;;  %v300_v11 = vmax.f32 %v923_v1, %v299_v7  ;;  %v779_v22 = vmov 0   ;;  %vm408_vm14 = vcmask 1040384   ;;  %s442_s11 = sshll.u32 %s224_s10, 4  ;;  %s1000_s11 = int_to_ptr.vmem [resolvable:$true] %s442_s11 }
  0x4c   : > { %s243_s9 = scalar_lea.vmem %s1086_s1, %s1106_s28  ;;  %v269_v19 = vsub.s32 0, %v939_v12  ;;  %v259_v21 = vadd.s32 128, %v258_v14  ;;  %v273_v24 = vsub.s32 1, %v939_v12  ;;  %v261_v28 = vadd.s32 %v260_v18, %v258_v14  ;;  %s572_s27 = sshll.u32 %s824_s16, 4 }
  0x4d   : > { %v255_v10 = vld [vmem:[%s243_s9] sm:$0x3]  ;;  %v292_v13 = vmax.f32 %v291_v9, %v929_v5  ;;  %v301_v15 = vmax.f32 %v300_v11, %v935_v8  ;;  %v352_v56 = vadd.s32 8, %v939_v12  ;;  %v353_v58 = vadd.s32 16, %v939_v12  ;;  %s230_s30 = scalar_lea.vmem [#allocation6], %s909_s19  ;;  %s1010_s8 = scalar_lea.hbm %s1087_s2, %s572_s27 }
  0x4e   : > { %vm265_vm1 = vcmp.ge.s32.totalorder %v255_v10, 0  ;;  %v262_v31 = vadd.s32 %v260_v18, %v259_v21  ;;  %vm263_vm2 = vcmp.lt.s32.totalorder %v261_v28, 300  ;;  %v282_v38 = vrot.slane %v255_v10, %v269_v19  ;;  %s455_s5 = sshll.u32 %s230_s30, 4  ;;  %s426_s17 = scalar_lea.sflag [#allocation4], %s909_s19  ;;  %s1012_s5 = int_to_ptr.vmem [resolvable:$true] %s455_s5 }
  0x4f   : > { %v293_v16 = vrot.slane %v292_v13, 4  ;;  %v302_v17 = vrot.slane %v301_v15, 4  ;;  %v266_v23 = vsel %vm265_vm1, 1, %v779_v22  ;;  %v286_v43 = vrot.slane %v255_v10, %v273_v24  ;;  %s676_s20 = scalar_lea.vmem %s1000_s11, 16  ;;  %s781_s25 = smov [#allocation5]  }
  0x50   : > { %v270_v29 = vrot.slane %v266_v23, %v269_v19  ;;  %v274_v32 = vrot.slane %v266_v23, %v273_v24  ;;  %vm264_vm4 = vcmp.lt.s32.totalorder %v262_v31, 300  ;;  %p677_p6 = scmp.ne.s32.totalorder %s1000_s11, %s676_s20  ;;  %s680_s26 = sshll.u32 %s781_s25, 4  ;;  %s681_s26 = int_to_ptr.vmem [resolvable:$false] %s680_s26 }
  0x51   : > { %v294_v20 = vmax.f32 %v292_v13, %v293_v16  ;;  %v303_v25 = vmax.f32 %v301_v15, %v302_v17  ;;  %s682_s28 = scalar_lea.vmem %s681_s26, 32  ;;  %p683_p12 = scmp.lt.s32.totalorder %s1000_s11, %s681_s26 }
  0x52   : > { %vm275_vm3 = vcmp.ne.s32.totalorder %v270_v29, 0  ;;  %vm276_vm5 = vcmp.ne.s32.totalorder %v274_v32, 0  ;;  %p678_p13 = pnand %p677_p6, %p847_p9  ;;  %p684_p0 = scmp.lt.s32.totalorder %s682_s28, %s676_s20 }
  0x53   : > { %v295_v26 = vrot.slane %v294_v20, 2  ;;  %v304_v27 = vrot.slane %v303_v25, 2  ;;  %vm956_vm6 = vmand %vm263_vm2, %vm275_vm3 }
  0x54   : > { %vm966_vm7 = vmand %vm264_vm4, %vm276_vm5  ;;  %v287_v52 = vsel %vm956_vm6, %v282_v38, 0  ;;  %p679_p8 = pneg %p678_p13  ;;  %p685_p1 = por %p684_p0, %p683_p12 }
  0x55   : > { %v296_v30 = vmax.f32 %v294_v20, %v295_v26  ;;  %v305_v33 = vmax.f32 %v303_v25, %v304_v27  ;;  %v288_v54 = vsel %vm966_vm7, %v286_v43, 0  ;;  %v357_v57 = vrot.slane %v287_v52, %v269_v19 }
  0x56   : > { %v361_v59 = vrot.slane %v288_v54, %v269_v19  ;;  %p686_p3 = pnand %p685_p1, %p679_p8 }
  0x57   : > { %v297_v34 = vrot.slane %v296_v30, 1  ;;  %v306_v35 = vrot.slane %v305_v33, 1  ;;  %vm362_vm8 = vcmp.eq.s32.totalorder %v939_v12, %v357_v57  ;;  %vm364_vm9 = vcmp.eq.s32.totalorder %v352_v56, %v357_v57 }
  0x58   : > { %vm363_vm10 = vcmp.eq.s32.totalorder %v939_v12, %v361_v59  ;;  %vm365_vm11 = vcmp.eq.s32.totalorder %v352_v56, %v361_v59  ;;  %vm366_vm12 = vcmp.eq.s32.totalorder %v353_v58, %v357_v57  ;;  %vm367_vm13 = vcmp.eq.s32.totalorder %v353_v58, %v361_v59 }
  0x59   : > { %v946_v36 = vmax.f32 %v296_v30, %v297_v34  ;;  %v948_v37 = vmax.f32 %v305_v33, %v306_v35  ;;  %v368_v61 = vsel %vm362_vm8, %v918_v0, 0.0  ;;  %v370_v62 = vsel %vm364_vm9, %v929_v5, 0.0 }
  0x5a   : > { %v369_v4 = vsel %vm363_vm10, %v923_v1, 0.0  ;;  %v371_v6 = vsel %vm365_vm11, %v935_v8, 0.0  ;;  %v372_v7 = vsel %vm366_vm12, %v925_v2, 0.0  ;;  %v373_v10 = vsel %vm367_vm13, %v927_v3, 0.0 }
  0x5b   : > { %v308_v39 = vsub.f32 %v918_v0, %v946_v36  ;;  %v310_v40 = vsub.f32 %v929_v5, %v946_v36  ;;  %v312_v41 = vsub.f32 %v925_v2, %v946_v36  ;;  %v309_v44 = vsub.f32 %v923_v1, %v948_v37 }
  0x5c   : > { %v311_v45 = vsub.f32 %v935_v8, %v948_v37  ;;  %v313_v46 = vsub.f32 %v927_v3, %v948_v37  ;;  %v374_v13 = vadd.f32 %v370_v62, %v368_v61  ;;  %v375_v16 = vsel %vm289_vm0, %v372_v7, 0.0 }
  0x5d   : > { %v314_v48 = vmul.f32 1.442695, %v308_v39  ;;  %v318_v49 = vmul.f32 1.442695, %v310_v40  ;;  %v316_v50 = vmul.f32 1.442695, %v309_v44  ;;  %v383_v0 = vadd.f32 %v371_v6, %v369_v4 }
  0x5e   : > { %v320_v51 = vmul.f32 1.442695, %v311_v45  ;;  %v322_v53 = vmul.f32 1.442695, %v312_v41  ;;  %v324_v55 = vmul.f32 1.442695, %v313_v46  ;;  %v376_v19 = vadd.f32 %v375_v16, %v374_v13 }
  0x5f   : > { %628 = vpow2.f32 %v314_v48  ;;  %v384_v1 = vsel %vm289_vm0, %v373_v10, 0.0 }
  0x60   : > { %630 = vpow2.f32 %v316_v50  ;;  %v385_v3 = vadd.f32 %v384_v1, %v383_v0  ;;  %v377_v24 = vrot.slane %v376_v19, 4 }
  0x61   : > { %632 = vpow2.f32 %v318_v49 }
  0x62   : > { %634 = vpow2.f32 %v320_v51  ;;  %v386_v26 = vrot.slane %v385_v3, 4  ;;  %v378_v30 = vadd.f32 %v377_v24, %v376_v19 }
  0x63   : > { %636 = vpow2.f32 %v322_v53 }
  0x64   : > { %638 = vpow2.f32 %v324_v55  ;;  %v387_v32 = vadd.f32 %v386_v26, %v385_v3  ;;  %v379_v38 = vrot.slane %v378_v30, 2 }
  0x66   : > { %v388_v39 = vrot.slane %v387_v32, 2  ;;  %v380_v40 = vadd.f32 %v379_v38, %v378_v30 }
  0x68   : > { %v389_v41 = vadd.f32 %v388_v39, %v387_v32  ;;  %v381_v43 = vrot.slane %v380_v40, 1 }
  0x69   : > { %v629_v60 = vpop.eup %628 }
  0x6a   : > { %v631_v63 = vpop.eup %630  ;;  %v390_v44 = vrot.slane %v389_v41, 1  ;;  %v382_v49 = vadd.f32 %v381_v43, %v380_v40 }
  0x6b   : > { %v633_v9 = vpop.eup %632 }
  0x6c   : > { %v635_v11 = vpop.eup %634  ;;  %v326_v12 = vadd.f32 %v633_v9, %v629_v60  ;;  %v391_v51 = vadd.f32 %v390_v44, %v389_v41 }
  0x6d   : > { %v637_v14 = vpop.eup %636  ;;  %v335_v15 = vadd.f32 %v635_v11, %v631_v63 }
  0x6e   : > { %v639_v17 = vpop.eup %638  ;;  %v327_v5 = vsel %vm289_vm0, %v637_v14, 0.0 }
  0x6f   : > { %v328_v18 = vadd.f32 %v327_v5, %v326_v12  ;;  %v336_v8 = vsel %vm289_vm0, %v639_v17, 0.0 }
  0x70   : > { %v337_v2 = vadd.f32 %v336_v8, %v335_v15 }
  0x71   : > { %v329_v20 = vrot.slane %v328_v18, 4 }
  0x72   : > { %v338_v21 = vrot.slane %v337_v2, 4 }
  0x73   : > { %v330_v22 = vadd.f32 %v329_v20, %v328_v18 }
  0x74   : > { %v339_v23 = vadd.f32 %v338_v21, %v337_v2 }
  0x75   : > { %v331_v25 = vrot.slane %v330_v22, 2 }
  0x76   : > { %v340_v27 = vrot.slane %v339_v23, 2 }
  0x77   : > { %v332_v28 = vadd.f32 %v331_v25, %v330_v22 }
  0x78   : > { %v341_v29 = vadd.f32 %v340_v27, %v339_v23 }
  0x79   : > { %v333_v31 = vrot.slane %v332_v28, 1 }
  0x7a   : > { %v342_v33 = vrot.slane %v341_v29, 1 }
  0x7b   : > { %v334_v34 = vadd.f32 %v333_v31, %v332_v28 }
  0x7c   : > { %v343_v35 = vadd.f32 %v342_v33, %v341_v29 }
  0x7d   : > { %640 = vlog2.f32 %v334_v34 }
  0x7e   : > { %642 = vlog2.f32 %v343_v35 }
  0x87   : > { %v641_v45 = vpop.eup %640 }
  0x88   : > { %v643_v46 = vpop.eup %642  ;;  %v345_v48 = vmul.f32 0.6931472, %v641_v45 }
  0x89   : > { %v347_v50 = vmul.f32 0.6931472, %v643_v46 }
  0x8a   : > { %v348_v52 = vadd.f32 %v345_v48, %v946_v36 }
  0x8b   : > { %v349_v53 = vadd.f32 %v347_v50, %v948_v37  ;;  %v780_v37 = vmov 0.0  }
  0x8c   : > { %v392_v54 = vsub.f32 %v382_v49, %v348_v52  ;;  %v570_v9 = vsel %vm956_vm6, 1.0, %v780_v37  ;;  %v571_v10 = vsel %vm966_vm7, 1.0, %v780_v37 }
  0x8d   : > { %v393_v55 = vsub.f32 %v391_v51, %v349_v53  ;;  %v418_v15 = vsel %vm408_vm14, %v570_v9, 0.0  ;;  %v419_v16 = vsel %vm408_vm14, %v571_v10, 0.0 }
  0x8e   : > { %v394_v56 = vmul.f32 1.442695, %v392_v54  ;;  %v420_v17 = vadd.f32 %v419_v16, %v418_v15 }
  0x8f   : > { %v396_v57 = vmul.f32 1.442695, %v393_v55 }
  0x90   : > { %644 = vpow2.f32 %v394_v56 }
  0x91   : > { %646 = vpow2.f32 %v396_v57 }
  0x9a   : > { %v645_v58 = vpop.eup %644 }
  0x9b   : > { %v647_v59 = vpop.eup %646  ;;  %v398_v60 = vsub.f32 1.0, %v645_v58 }
  0x9c   : > { %v399_v61 = vsub.f32 1.0, %v647_v59 }
  0x9d   : > { %v400_v62 = vmul.f32 %v398_v60, %v398_v60 }
  0x9e   : > { %v401_v63 = vmul.f32 %v399_v61, %v399_v61 }
  0x9f   : > { %v402_v4 = vsub.f32 0.0, %v400_v62 }
  0xa0   : > { %v403_v6 = vsub.f32 0.0, %v401_v63 }
  0xa1   : > { %v404_v7 = vmul.f32 %v402_v4, %v392_v54 }
  0xa2   : > { %v405_v36 = vmul.f32 %v403_v6, %v393_v55 }
  0xa3   : > { %v406_v11 = vsel %vm956_vm6, %v404_v7, 0.0 }
  0xa4   : > { %v407_v12 = vsel %vm966_vm7, %v405_v36, 0.0  ;;  %v409_v13 = vsel %vm408_vm14, %v406_v11, 0.0 }
  0xa5   : > { %v410_v14 = vsel %vm408_vm14, %v407_v12, 0.0 }
  0xa6   : > { %v411_v0 = vadd.f32 %v410_v14, %v409_v13 }
  0xa8   : > { %412 = vadd.xlane.f32.xlu0 %v411_v0 }
  0xac   : > { %421 = vadd.xlane.f32.xlu0 %v420_v17 }
 0x135   : > { %v413_v42 = vpop.xlane.xlu0 %412 }
 0x136   : > { %423 = vst [vmem:[%s224_s10] sm:$0x1] %v413_v42 }
 0x137   : > { %689 = shalt.err (!%p686_p3)
}
 0x138   : > { %s690_s29 = scalar_lea.hbm %s1010_s8, 16  ;;  %s694_s22 = scalar_lea.hbm %s1087_s2, 32 }
 0x139   : > { %p691_p4 = scmp.ne.s32.totalorder %s1010_s8, %s690_s29  ;;  %p695_p7 = scmp.lt.u32.totalorder %s1010_s8, %s1087_s2 }
 0x13a   : > { %p696_p10 = scmp.lt.u32.totalorder %s694_s22, %s690_s29  ;;  %p698_p6 = scmp.lt.u32.totalorder %s690_s29, %s1010_s8 }
 0x13b   : > { %p692_p5 = pnand %p691_p4, %p847_p9 }
 0x13c   : > { %p697_p11 = por %p696_p10, %p695_p7 }
 0x13d   : > { %p693_p2 = pneg %p692_p5 }
 0x13e   : > { %p699_p13 = por %p698_p6, %p697_p11 }
 0x140   : > { %p700_p8 = pnand %p699_p13, %p693_p2 }
 0x142   : > { %703 = shalt.err (!%p700_p8)
}
 0x143   : > { %580 = dma.vmem_to_hbm [thread:$0]  (%p847_p9), %s1000_s11, 16, %s1010_s8, %s426_s17   ;;  %v422_v47 = vpop.xlane.xlu0 %421 }
 0x144   : > { %s1041_s25 = scalar_lea.hbm %s1088_s3, %s572_s27  ;;  %424 = vst [vmem:[%s230_s30] sm:$0x1] %v422_v47  ;;  %s430_s26 = scalar_lea.sflag [#allocation7], %s909_s19 }
 0x145   : > { %s704_s28 = scalar_lea.vmem %s1012_s5, 16  ;;  %s782_s29 = smov [#allocation6]  }
 0x146   : > { %p705_p12 = scmp.ne.s32.totalorder %s1012_s5, %s704_s28  ;;  %s708_s4 = sshll.u32 %s782_s29, 4  ;;  %s709_s4 = int_to_ptr.vmem [resolvable:$false] %s708_s4 }
 0x147   : > { %s710_s9 = scalar_lea.vmem %s709_s4, 32  ;;  %p711_p3 = scmp.lt.s32.totalorder %s1012_s5, %s709_s4 }
 0x148   : > { %p706_p0 = pnand %p705_p12, %p847_p9  ;;  %p712_p4 = scmp.lt.s32.totalorder %s710_s9, %s704_s28 }
 0x14a   : > { %p707_p1 = pneg %p706_p0  ;;  %p713_p5 = por %p712_p4, %p711_p3 }
 0x14c   : > { %p714_p2 = pnand %p713_p5, %p707_p1 }
 0x14e   : > { %717 = shalt.err (!%p714_p2)
}
 0x14f   : > { %s718_s16 = scalar_lea.hbm %s1041_s25, 16  ;;  %s722_s27 = scalar_lea.hbm %s1088_s3, 32 }
 0x150   : > { %p719_p7 = scmp.ne.s32.totalorder %s1041_s25, %s718_s16  ;;  %p723_p6 = scmp.lt.u32.totalorder %s1041_s25, %s1088_s3 }
 0x151   : > { %p724_p13 = scmp.lt.u32.totalorder %s722_s27, %s718_s16  ;;  %p726_p12 = scmp.lt.u32.totalorder %s718_s16, %s1041_s25 }
 0x152   : > { %p720_p10 = pnand %p719_p7, %p847_p9 }
 0x153   : > { %p725_p8 = por %p724_p13, %p723_p6 }
 0x154   : > { %p721_p11 = pneg %p720_p10 }
 0x155   : > { %p727_p0 = por %p726_p12, %p725_p8 }
 0x157   : > { %p728_p1 = pnand %p727_p0, %p721_p11 }
 0x159   : > { %731 = shalt.err (!%p728_p1)
}
 0x15a   : > { %581 = dma.vmem_to_hbm [thread:$0]  (%p847_p9), %s1012_s5, 16, %s1041_s25, %s430_s26  }
 0x15b PF: > { %s467_s17 = sand.u32 1, %s762_s12   ;;  %p1097_p3 = scmp.ne.s32.totalorder %s1092_s24, 0 }
 0x15c   : > { %p1098_p4 = scmp.ge.s32.totalorder %s774_s15, 2  ;;  %s468_s22 = scalar_lea.sflag [#allocation4], %s467_s17 }
 0x15e   : > { %p585_p5 = pnand %p1098_p4, %p1097_p3 }
 0x160   : > { %753 = dma.done.wait (!%p585_p5), %s468_s22, 16  }
 0x161   : > { %755 = vsyncadd (!%p585_p5), %s468_s22, 4294967280  ;;  %s476_s10 = scalar_lea.sflag [#allocation7], %s467_s17 }
 0x162   : > { %757 = dma.done.wait (!%p585_p5), %s476_s10, 16  }
 0x163   : > { %759 = vsyncadd (!%p585_p5), %s476_s10, 4294967280  ;;  %p20_p9 = scmp.ge.s32.totalorder %s828_s18, 4   ;;  %s1099_s12 = smov %s766_s13 }
 0x164   : > { %s1100_s13 = smov %s770_s14  ;;  %s1101_s14 = smov %s840_s21 }
 0x165   : > { %s1102_s15 = smov %s828_s18  ;;  %22 = sbr.rel (!%p20_p9) target bundleno = 7 (0x7), region = 93 }
 0x16c   :  { %480 = vsyncpa [#allocation3], 1 }
 0x16d   :  { %482 = vsyncpa [#allocation3 + $0x1], 1 }
 0x16e   :  { %483 = vsyncpa [#allocation4], 1 }
 0x16f   :  { %485 = vsyncpa [#allocation4 + $0x1], 1 }
 0x170   :  { %486 = vsyncpa [#allocation7], 1 }
 0x171   :  { %488 = vsyncpa [#allocation7 + $0x1], 1 }

</bundles_post_ra>
